<compile_context>
chip_gen: v6e
topology: v6e:2x2x1
jax: 0.10.0
libtpu: 0.0.40
codegen_flags: <defaults>
</compile_context>

<pallas_src>
import jax
import jax.numpy as jnp
from jax.experimental import pallas as pl
from jax.experimental.pallas import tpu as pltpu

IN_DIM = 768
HID_DIM = 512


def _critic_kernel(state_ref, w1_ref, b1_ref, w2_ref, b2_ref, out_ref):
    # state_ref: (TM, 768)        w1_ref: (768, 512) bf16   b1_ref: (1, 512) f32
    # w2_ref:    (1, 512) f32     b2_ref: (1, 1) f32        out_ref: (1, TM) f32
    x = state_ref[...]
    if x.dtype != jnp.bfloat16:
        # In-kernel cast only when the caller did not supply bf16 state.
        x = x.astype(jnp.bfloat16)

    # Linear(768 -> 512): bf16 MXU matmul, f32 accumulation. + bias + ReLU.
    h = jnp.dot(x, w1_ref[...], preferred_element_type=jnp.float32) + b1_ref[...]
    h = jnp.maximum(h, 0.0)                                   # (TM, 512) f32

    # Dropout == identity (eval / inference forward).

    # Linear(512 -> 1) as VPU multiply + XLU row-reduce (keeps the MXU free).
    v = jnp.sum(h * w2_ref[...], axis=1, keepdims=True)       # (TM, 1) f32

    # Lane-dense store: (TM, 1) -> (1, TM) relayout goes through the XLU.
    out_ref[...] = (v.reshape(1, -1) + b2_ref[...]).astype(out_ref.dtype)


def _round_up(x: int, m: int) -> int:
    return ((x + m - 1) // m) * m


def critic_forward(state, w1, b1, w2, b2, *, block_rows: int = 512):
    """Pallas equivalent of Critic.forward (eval mode).

    state: (B, 768); w1: (768, 512); b1: (512,); w2: (512, 1); b2: (1,).
    Returns state2value(state).squeeze() as float32.
    """
    B, D = state.shape
    assert D == IN_DIM and w1.shape == (IN_DIM, HID_DIM)
    assert b1.shape == (HID_DIM,) and w2.shape == (HID_DIM, 1) and b2.shape == (1,)

    # Row-stripe size: large stripes amortize the ~0.35us per-grid-step overhead.
    if B >= block_rows:
        tm = block_rows                       # keep a multiple of 256 for the MXU
    else:
        tm = _round_up(B, 8)                  # single (partial) stripe
    nblk = pl.cdiv(B, tm)

    # Parameters: W1 in bf16 (MXU operand), everything else small f32.
    w1_bf16 = w1.astype(jnp.bfloat16)
    b1_2d = b1.reshape(1, HID_DIM).astype(jnp.float32)
    w2_row = w2.reshape(1, HID_DIM).astype(jnp.float32)      # VPU operand
    b2_2d = b2.reshape(1, 1).astype(jnp.float32)

    in_bytes = B * IN_DIM * state.dtype.itemsize
    w_bytes = IN_DIM * HID_DIM * 2 + HID_DIM * 4 * 2 + 4
    out_bytes = nblk * tm * 4

    out = pl.pallas_call(
        _critic_kernel,
        out_shape=jax.ShapeDtypeStruct((1, nblk * tm), jnp.float32),
        grid=(nblk,),
        in_specs=[
            pl.BlockSpec((tm, IN_DIM), lambda i: (i, 0)),        # row stripe (pipelined)
            pl.BlockSpec((IN_DIM, HID_DIM), lambda i: (0, 0)),   # W1 resident in VMEM
            pl.BlockSpec((1, HID_DIM), lambda i: (0, 0)),        # b1 resident
            pl.BlockSpec((1, HID_DIM), lambda i: (0, 0)),        # w2 row resident
            pl.BlockSpec((1, 1), lambda i: (0, 0)),              # b2 resident
        ],
        out_specs=pl.BlockSpec((1, tm), lambda i: (0, i)),       # lane-dense output
        compiler_params=pltpu.CompilerParams(
            dimension_semantics=("parallel",),
        ),
        cost_estimate=pl.CostEstimate(
            flops=2 * B * IN_DIM * HID_DIM + 2 * B * HID_DIM,
            transcendentals=0,
            bytes_accessed=in_bytes + w_bytes + out_bytes,
        ),
    )(state, w1_bf16, b1_2d, w2_row, b2_2d)

    # (1, nblk*tm) -> (B,) (or scalar if B == 1, matching torch .squeeze()).
    return jnp.squeeze(out[0, :B])


def critic_ref(state, w1, b1, w2, b2):
    """Pure-JAX reference (eval-mode dropout == identity)."""
    h = jnp.maximum(state.astype(jnp.float32) @ w1 + b1, 0.0)
    v = h @ w2 + b2
    return jnp.squeeze(v)


if __name__ == "__main__":
    key = jax.random.PRNGKey(0)
    k1, k2, k3, k4, k5, k6 = jax.random.split(key, 6)

    # Parameters, stored as (in, out) — the transpose of torch's (out, in) layout.
    w1 = jax.random.normal(k2, (IN_DIM, HID_DIM), dtype=jnp.float32) * 0.02
    b1 = jax.random.normal(k3, (HID_DIM,), dtype=jnp.float32) * 0.02
    w2 = jax.random.normal(k4, (HID_DIM, 1), dtype=jnp.float32) * 0.02
    b2 = jax.random.normal(k5, (1,), dtype=jnp.float32) * 0.02

    # Test 1: small batch, f32 state (in-kernel bf16 cast path), single stripe.
    B = 8
    state = jax.random.normal(k1, (B, IN_DIM), dtype=jnp.float32)
    out = critic_forward(state, w1, b1, w2, b2)
    jax.block_until_ready(out)
    ref = critic_ref(state, w1, b1, w2, b2)
    assert out.shape == ref.shape, (out.shape, ref.shape)
    # bf16 MXU operands (f32 accumulation) => relaxed tolerance vs f32 reference.
    assert jnp.allclose(out, ref, atol=5e-2, rtol=5e-2), (out, ref)

    # Test 2: bf16 state, batch not a multiple of the stripe -> multi-step grid
    # with a masked trailing partial input block.
    B2 = 300
    state2 = jax.random.normal(k6, (B2, IN_DIM), dtype=jnp.float32)
    state2_bf16 = state2.astype(jnp.bfloat16)
    out2 = critic_forward(state2_bf16, w1, b1, w2, b2, block_rows=128)
    jax.block_until_ready(out2)
    ref2 = critic_ref(state2_bf16.astype(jnp.float32), w1, b1, w2, b2)
    assert out2.shape == ref2.shape, (out2.shape, ref2.shape)
    assert jnp.allclose(out2, ref2, atol=5e-2, rtol=5e-2)

    print("KERNEL_OK")
</pallas_src>

<mosaic_0001>
module attributes {stable_mosaic.version = 11 : i64} {
  func.func @_critic_kernel(%arg0: i32, %arg1: memref<8x768xf32, #tpu.memory_space<vmem>>, %arg2: memref<768x512xbf16, #tpu.memory_space<vmem>>, %arg3: memref<1x512xf32, #tpu.memory_space<vmem>>, %arg4: memref<1x512xf32, #tpu.memory_space<vmem>>, %arg5: memref<1x1xf32, #tpu.memory_space<vmem>>, %arg6: memref<1x8xf32, #tpu.memory_space<vmem>>) attributes {dimension_semantics = [#tpu.dimension_semantics<parallel>], iteration_bounds = array<i64: 1>, scalar_prefetch = 0 : i64, scratch_operands = 0 : i64, tpu.core_type = #tpu.core_type<tc>, window_params = [{transform_indices = @transform_0, window_bounds = array<i64: 8, 768>}, {pipeline_mode = #tpu.pipeline_mode<synchronous>, transform_indices = @transform_1, window_bounds = array<i64: 768, 512>}, {pipeline_mode = #tpu.pipeline_mode<synchronous>, transform_indices = @transform_2, window_bounds = array<i64: 1, 512>}, {pipeline_mode = #tpu.pipeline_mode<synchronous>, transform_indices = @transform_3, window_bounds = array<i64: 1, 512>}, {pipeline_mode = #tpu.pipeline_mode<synchronous>, transform_indices = @transform_4, window_bounds = array<i64: 1, 1>}, {transform_indices = @transform_5, window_bounds = array<i64: 1, 8>}]} {
    %c0 = arith.constant 0 : index
    %c0_0 = arith.constant 0 : index
    %0 = vector.load %arg1[%c0, %c0_0] : memref<8x768xf32, #tpu.memory_space<vmem>>, vector<8x768xf32>
    %1 = arith.truncf %0 : vector<8x768xf32> to vector<8x768xbf16>
    %c0_1 = arith.constant 0 : index
    %c0_2 = arith.constant 0 : index
    %2 = vector.load %arg2[%c0_1, %c0_2] : memref<768x512xbf16, #tpu.memory_space<vmem>>, vector<768x512xbf16>
    %cst = arith.constant dense<0.000000e+00> : vector<8x512xf32>
    %3 = tpu.matmul %1, %2, %cst {dimension_numbers = #tpu.dot_dimension_numbers<[1], [0], [0], [1], [0, 0, 1, 1], [], []>} : vector<8x768xbf16>, vector<768x512xbf16>, vector<8x512xf32> -> vector<8x512xf32>
    %c0_3 = arith.constant 0 : index
    %c0_4 = arith.constant 0 : index
    %4 = vector.load %arg3[%c0_3, %c0_4] : memref<1x512xf32, #tpu.memory_space<vmem>>, vector<1x512xf32>
    %5 = vector.broadcast %4 : vector<1x512xf32> to vector<8x512xf32>
    %6 = arith.addf %3, %5 : vector<8x512xf32>
    %cst_5 = arith.constant 0.000000e+00 : f32
    %7 = vector.broadcast %cst_5 : f32 to vector<8x512xf32>
    %8 = arith.maximumf %6, %7 : vector<8x512xf32>
    %c0_6 = arith.constant 0 : index
    %c0_7 = arith.constant 0 : index
    %9 = vector.load %arg4[%c0_6, %c0_7] : memref<1x512xf32, #tpu.memory_space<vmem>>, vector<1x512xf32>
    %10 = vector.broadcast %9 : vector<1x512xf32> to vector<8x512xf32>
    %11 = arith.mulf %8, %10 : vector<8x512xf32>
    %cst_8 = arith.constant dense<0.000000e+00> : vector<8xf32>
    %12 = vector.multi_reduction <add>, %11, %cst_8 [1] : vector<8x512xf32> to vector<8xf32>
    %13 = vector.shape_cast %12 : vector<8xf32> to vector<8x1xf32>
    %14 = vector.shape_cast %13 : vector<8x1xf32> to vector<1x8xf32>
    %c0_9 = arith.constant 0 : index
    %c0_10 = arith.constant 0 : index
    %15 = vector.load %arg5[%c0_9, %c0_10] : memref<1x1xf32, #tpu.memory_space<vmem>>, vector<1x1xf32>
    %16 = vector.broadcast %15 : vector<1x1xf32> to vector<1x8xf32>
    %17 = arith.addf %14, %16 : vector<1x8xf32>
    %c0_11 = arith.constant 0 : index
    %c0_12 = arith.constant 0 : index
    %18 = vector.load %arg6[%c0_11, %c0_12] : memref<1x8xf32, #tpu.memory_space<vmem>>, vector<1x8xf32>
    tpu.vector_store %arg6[%c0_11, %c0_12], %17 {strides = array<i32>} : memref<1x8xf32, #tpu.memory_space<vmem>>, vector<1x8xf32>,
    return
  }
  func.func @transform_0(%arg0: i32) -> (i32, i32) {
    %c0_i32 = arith.constant 0 : i32
    %c0_i32_0 = arith.constant 0 : i32
    return %arg0, %c0_i32 : i32, i32
  }
  func.func @transform_1(%arg0: i32) -> (i32, i32) {
    %c0_i32 = arith.constant 0 : i32
    %c0_i32_0 = arith.constant 0 : i32
    %c0_i32_1 = arith.constant 0 : i32
    return %c0_i32, %c0_i32_0 : i32, i32
  }
  func.func @transform_2(%arg0: i32) -> (i32, i32) {
    %c0_i32 = arith.constant 0 : i32
    %c0_i32_0 = arith.constant 0 : i32
    %c0_i32_1 = arith.constant 0 : i32
    return %c0_i32, %c0_i32_0 : i32, i32
  }
  func.func @transform_3(%arg0: i32) -> (i32, i32) {
    %c0_i32 = arith.constant 0 : i32
    %c0_i32_0 = arith.constant 0 : i32
    %c0_i32_1 = arith.constant 0 : i32
    return %c0_i32, %c0_i32_0 : i32, i32
  }
  func.func @transform_4(%arg0: i32) -> (i32, i32) {
    %c0_i32 = arith.constant 0 : i32
    %c0_i32_0 = arith.constant 0 : i32
    %c0_i32_1 = arith.constant 0 : i32
    return %c0_i32, %c0_i32_0 : i32, i32
  }
  func.func @transform_5(%arg0: i32) -> (i32, i32) {
    %c0_i32 = arith.constant 0 : i32
    %c0_i32_0 = arith.constant 0 : i32
    return %c0_i32, %arg0 : i32, i32
  }
}

</mosaic_0001>

<bundles_post_ra>
// kernel: tpu_custom_call.1
= control target key start
LH: loop header
LB: loop body
LE: loop exit
PB: predicated region body
PF: predicated region fallthrough
CT: control target
= control target key end

     0   :  { %s2231_s0 = inlined_call_operand.hbm [shape: f32[8,768], index: 0, kind: input, shape index: {}]   ;;  %s2232_s1 = inlined_call_operand.hbm [shape: bf16[768,512], index: 1, kind: input, shape index: {}]   ;;  %s2233_s2 = inlined_call_operand.vmem [shape: f32[1,512], index: 2, kind: input, shape index: {}]   ;;  %s2234_s3 = inlined_call_operand.hbm [shape: f32[1,512], index: 3, kind: input, shape index: {}]   ;;  %s2235_s4 = inlined_call_operand.<no memory space> [shape: f32[1,1], index: 4, kind: input, shape index: {}]   ;;  %s2236_s5 = inlined_call_operand.hbm [shape: f32[1,8], index: 5, kind: output, shape index: {}]  }
   0x1   :  { %v10_v0 = vstv %s2235_s4 }
   0x2   :  { %11 = vst [vmem:[#allocation2] sm:$0x1] %v10_v0 }
   0x3   :  { %12 = vsyncpa [#allocation4], 0 }
   0x4   :  { %13 = vsyncpa [#allocation7], 0 }
   0x5   :  { %14 = vsyncpa [#allocation5], 0  ;;  %s2138_s20 = smov [#allocation6]  }
   0x6   :  { %s30_s21 = sshll.u32 %s2138_s20, 4  ;;  %s31_s21 = int_to_ptr.vmem [resolvable:$true] %s30_s21 }
   0x7   :  { %s2060_s22 = scalar_lea.vmem %s31_s21, 24576  ;;  %p2065_p1 = scmp.lt.s32.totalorder %s31_s21, %s31_s21 }
   0x8   :  { %p2061_p0 = scmp.ne.s32.totalorder %s31_s21, %s2060_s22  ;;  %p2066_p2 = scmp.lt.s32.totalorder %s2060_s22, %s2060_s22 }
   0xa   :  { %p2067_p3 = por %p2066_p2, %p2065_p1 }
   0xc   :  { %p2068_p4 = pnand %p2067_p3, %p2061_p0 }
   0xe   :  { %2071 = shalt.err (!%p2068_p4)
}
   0xf   :  { %s2139_s23 = smov 256   ;;  %s2140_s24 = smov 16  }
  0x10   :  { %36 = dma.hbm_to_vmem [thread:$0]  %s2232_s1, 24576, %s31_s21, [#allocation7], %s2139_s23, %s2139_s23, %s2140_s24  }
  0x11   :  { %s2141_s4 = smov [#allocation3]   ;;  %s2142_s28 = smov [#allocation8]  }
  0x12   :  { %s21_s27 = sshll.u32 %s2141_s4, 4  ;;  %s45_s29 = sshll.u32 %s2142_s28, 4  ;;  %s22_s27 = int_to_ptr.vmem [resolvable:$true] %s21_s27  ;;  %s46_s29 = int_to_ptr.vmem [resolvable:$true] %s45_s29 }
  0x13   :  { %s2080_s30 = scalar_lea.vmem %s22_s27, 768  ;;  %p2085_p6 = scmp.lt.s32.totalorder %s22_s27, %s22_s27 }
  0x14   :  { %p2081_p5 = scmp.ne.s32.totalorder %s22_s27, %s2080_s30  ;;  %p2086_p7 = scmp.lt.s32.totalorder %s2080_s30, %s2080_s30 }
  0x16   :  { %p2087_p8 = por %p2086_p7, %p2085_p6 }
  0x18   :  { %p2088_p9 = pnand %p2087_p8, %p2081_p5 }
  0x1a   :  { %2091 = shalt.err (!%p2088_p9)
}
  0x1b   :  { %24 = dma.hbm_to_vmem [thread:$0]  %s2231_s0, 768, %s22_s27, [#allocation4]  }
  0x1c   :  { %s2100_s8 = scalar_lea.vmem %s46_s29, 64  ;;  %p2105_p11 = scmp.lt.s32.totalorder %s46_s29, %s46_s29 }
  0x1d   :  { %p2101_p10 = scmp.ne.s32.totalorder %s46_s29, %s2100_s8  ;;  %p2106_p12 = scmp.lt.s32.totalorder %s2100_s8, %s2100_s8 }
  0x1f   :  { %p2107_p13 = por %p2106_p12, %p2105_p11 }
  0x21   :  { %p2108_p0 = pnand %p2107_p13, %p2101_p10 }
  0x23   :  { %2111 = shalt.err (!%p2108_p0)
}
  0x24   :  { %48 = dma.hbm_to_vmem [thread:$0]  %s2234_s3, 64, %s46_s29, [#allocation7]  }
  0x25   :  { %2132 = dma.done.wait [#allocation4], 768  }
  0x26   :  { %2133 = vsyncadd [#allocation4], 4294966528 }
  0x27   :  { %2134 = dma.done.wait [#allocation7], 24640  }
  0x28   :  { %2135 = vsyncadd [#allocation7], 4294942656  ;;  %v1764_v1 = vld [vmem:[#allocation6 + $0xe4] ss:$16 sps:$4 sm:$0xff]   ;;  %v1768_v3 = vld [vmem:[#allocation6 + $0xe0] ss:$16 sps:$4 sm:$0xff]  }
  0x29   :  { %v1766_v2 = vld [vmem:[#allocation6 + $0x2e4] ss:$16 sps:$4 sm:$0xff]   ;;  %1246 = vmatprep.subr.bf16.mxu0 %v1764_v1  ;;  %v1769_v4 = vld [vmem:[#allocation6 + $0x2e0] ss:$16 sps:$4 sm:$0xff]   ;;  %v61_v47 = vld [vmem:[#allocation3 + $0x8] sm:$0xff]  ;;  %vm1546_vm0 = vcmask 57344  }
  0x2a   :  { %1287 = vmatprep.subr.bf16.mxu1 %v1766_v2  ;;  %v1770_v5 = vld [vmem:[#allocation6 + $0xc4] ss:$16 sps:$4 sm:$0xff]   ;;  %1247 = vmatpush1.bf16.msra.mxu0 %v1768_v3  ;;  %v1774_v7 = vld [vmem:[#allocation6 + $0xc0] ss:$16 sps:$4 sm:$0xff]   ;;  %v2187_v50 = vpack.c.bf16 %v61_v47, %v61_v47  ;;  %v63_v51 = vld [vmem:[#allocation3 + $0x18] sm:$0xff] }
  0x2b   :  { %1288 = vmatpush1.bf16.msra.mxu1 %v1769_v4  ;;  %v1772_v6 = vld [vmem:[#allocation6 + $0x2c4] ss:$16 sps:$4 sm:$0xff]   ;;  %1248 = vmatprep.subr.bf16.mxu0 %v1770_v5  ;;  %v1775_v8 = vld [vmem:[#allocation6 + $0x2c0] ss:$16 sps:$4 sm:$0xff]   ;;  %v2189_v53 = vpack.c.bf16 %v63_v51, %v63_v51 }
  0x2c   :  { %1289 = vmatprep.subr.bf16.mxu1 %v1772_v6  ;;  %v1776_v9 = vld [vmem:[#allocation6 + $0xa4] ss:$16 sps:$4 sm:$0xff]   ;;  %v1780_v11 = vld [vmem:[#allocation6 + $0xa0] ss:$16 sps:$4 sm:$0xff]   ;;  %1278 = vmatprep.mubr.bf16.mxu0 %v2187_v50 }
  0x2d   :  { %v1778_v10 = vld [vmem:[#allocation6 + $0x2a4] ss:$16 sps:$4 sm:$0xff]   ;;  %v1781_v12 = vld [vmem:[#allocation6 + $0x2a0] ss:$16 sps:$4 sm:$0xff]   ;;  %1319 = vmatprep.mubr.bf16.mxu1 %v2189_v53 }
  0x2e   :  { %1249 = vmatpush1.bf16.msra.mxu0 %v1774_v7  ;;  %v1782_v13 = vld [vmem:[#allocation6 + $0x84] ss:$16 sps:$4 sm:$0xff]   ;;  %v1786_v15 = vld [vmem:[#allocation6 + $0x80] ss:$16 sps:$4 sm:$0xff]  }
  0x2f   :  { %1290 = vmatpush1.bf16.msra.mxu1 %v1775_v8  ;;  %1250 = vmatprep.subr.bf16.mxu0 %v1776_v9  ;;  %v1784_v14 = vld [vmem:[#allocation6 + $0x284] ss:$16 sps:$4 sm:$0xff]   ;;  %v1787_v16 = vld [vmem:[#allocation6 + $0x280] ss:$16 sps:$4 sm:$0xff]   ;;  %v1865_v8 = vld [vmem:[#allocation6 + $0xec] ss:$16 sps:$4 sm:$0xff]  }
  0x30   :  { %1291 = vmatprep.subr.bf16.mxu1 %v1778_v10  ;;  %v1788_v17 = vld [vmem:[#allocation6 + $0x64] ss:$16 sps:$4 sm:$0xff]   ;;  %v1792_v19 = vld [vmem:[#allocation6 + $0x60] ss:$16 sps:$4 sm:$0xff]  }
  0x31   :  { %v1790_v18 = vld [vmem:[#allocation6 + $0x264] ss:$16 sps:$4 sm:$0xff]   ;;  %v1793_v20 = vld [vmem:[#allocation6 + $0x260] ss:$16 sps:$4 sm:$0xff]  }
  0x32   :  { %1251 = vmatpush1.bf16.msra.mxu0 %v1780_v11  ;;  %v1794_v21 = vld [vmem:[#allocation6 + $0x44] ss:$16 sps:$4 sm:$0xff]   ;;  %v1798_v23 = vld [vmem:[#allocation6 + $0x40] ss:$16 sps:$4 sm:$0xff]  }
  0x33   :  { %1292 = vmatpush1.bf16.msra.mxu1 %v1781_v12  ;;  %1252 = vmatprep.subr.bf16.mxu0 %v1782_v13  ;;  %v1796_v22 = vld [vmem:[#allocation6 + $0x244] ss:$16 sps:$4 sm:$0xff]   ;;  %v1799_v24 = vld [vmem:[#allocation6 + $0x240] ss:$16 sps:$4 sm:$0xff]   ;;  %v1863_v12 = vld [vmem:[#allocation6 + $0xe8] ss:$16 sps:$4 sm:$0xff]  }
  0x34   :  { %1293 = vmatprep.subr.bf16.mxu1 %v1784_v14  ;;  %v1800_v25 = vld [vmem:[#allocation6 + $0x24] ss:$16 sps:$4 sm:$0xff]   ;;  %v1804_v27 = vld [vmem:[#allocation6 + $0x20] ss:$16 sps:$4 sm:$0xff]   ;;  %v1871_v14 = vld [vmem:[#allocation6 + $0xcc] ss:$16 sps:$4 sm:$0xff]  }
  0x35   :  { %v1802_v26 = vld [vmem:[#allocation6 + $0x224] ss:$16 sps:$4 sm:$0xff]   ;;  %v1805_v28 = vld [vmem:[#allocation6 + $0x220] ss:$16 sps:$4 sm:$0xff]  }
  0x36   :  { %1253 = vmatpush1.bf16.msra.mxu0 %v1786_v15  ;;  %v1806_v29 = vld [vmem:[#allocation6 + $0x4] ss:$16 sps:$4 sm:$0xff]   ;;  %v1810_v31 = vld [vmem:[#allocation6] ss:$16 sps:$4 sm:$0xff]  }
  0x37   :  { %1294 = vmatpush1.bf16.msra.mxu1 %v1787_v16  ;;  %1254 = vmatprep.subr.bf16.mxu0 %v1788_v17  ;;  %v1808_v30 = vld [vmem:[#allocation6 + $0x204] ss:$16 sps:$4 sm:$0xff]   ;;  %v1811_v32 = vld [vmem:[#allocation6 + $0x200] ss:$16 sps:$4 sm:$0xff]   ;;  %v1869_v16 = vld [vmem:[#allocation6 + $0xc8] ss:$16 sps:$4 sm:$0xff]  }
  0x38   :  { %1295 = vmatprep.subr.bf16.mxu1 %v1790_v18  ;;  %v1812_v33 = vld [vmem:[#allocation6 + $0x1e4] ss:$16 sps:$4 sm:$0xff]   ;;  %v1816_v35 = vld [vmem:[#allocation6 + $0x1e0] ss:$16 sps:$4 sm:$0xff]   ;;  %v1877_v18 = vld [vmem:[#allocation6 + $0xac] ss:$16 sps:$4 sm:$0xff]  }
  0x39   :  { %v1814_v34 = vld [vmem:[#allocation6 + $0x3e4] ss:$16 sps:$4 sm:$0xff]   ;;  %v1817_v36 = vld [vmem:[#allocation6 + $0x3e0] ss:$16 sps:$4 sm:$0xff]  }
  0x3a   :  { %1255 = vmatpush1.bf16.msra.mxu0 %v1792_v19  ;;  %v1818_v37 = vld [vmem:[#allocation6 + $0x1c4] ss:$16 sps:$4 sm:$0xff]   ;;  %v1822_v39 = vld [vmem:[#allocation6 + $0x1c0] ss:$16 sps:$4 sm:$0xff]  }
  0x3b   :  { %1296 = vmatpush1.bf16.msra.mxu1 %v1793_v20  ;;  %1256 = vmatprep.subr.bf16.mxu0 %v1794_v21  ;;  %v1820_v38 = vld [vmem:[#allocation6 + $0x3c4] ss:$16 sps:$4 sm:$0xff]   ;;  %v1823_v40 = vld [vmem:[#allocation6 + $0x3c0] ss:$16 sps:$4 sm:$0xff]   ;;  %v1875_v20 = vld [vmem:[#allocation6 + $0xa8] ss:$16 sps:$4 sm:$0xff]  }
  0x3c   :  { %1297 = vmatprep.subr.bf16.mxu1 %v1796_v22  ;;  %v1824_v41 = vld [vmem:[#allocation6 + $0x1a4] ss:$16 sps:$4 sm:$0xff]   ;;  %v1828_v43 = vld [vmem:[#allocation6 + $0x1a0] ss:$16 sps:$4 sm:$0xff]   ;;  %v1883_v22 = vld [vmem:[#allocation6 + $0x8c] ss:$16 sps:$4 sm:$0xff]  }
  0x3d   :  { %v1826_v42 = vld [vmem:[#allocation6 + $0x3a4] ss:$16 sps:$4 sm:$0xff]   ;;  %v1829_v44 = vld [vmem:[#allocation6 + $0x3a0] ss:$16 sps:$4 sm:$0xff]  }
  0x3e   :  { %1257 = vmatpush1.bf16.msra.mxu0 %v1798_v23  ;;  %v1830_v45 = vld [vmem:[#allocation6 + $0x184] ss:$16 sps:$4 sm:$0xff]   ;;  %v1834_v48 = vld [vmem:[#allocation6 + $0x180] ss:$16 sps:$4 sm:$0xff]  }
  0x3f   :  { %1298 = vmatpush1.bf16.msra.mxu1 %v1799_v24  ;;  %1258 = vmatprep.subr.bf16.mxu0 %v1800_v25  ;;  %v1832_v46 = vld [vmem:[#allocation6 + $0x384] ss:$16 sps:$4 sm:$0xff]   ;;  %v1835_v49 = vld [vmem:[#allocation6 + $0x380] ss:$16 sps:$4 sm:$0xff]   ;;  %v1881_v24 = vld [vmem:[#allocation6 + $0x88] ss:$16 sps:$4 sm:$0xff]  }
  0x40   :  { %1299 = vmatprep.subr.bf16.mxu1 %v1802_v26  ;;  %v1836_v52 = vld [vmem:[#allocation6 + $0x164] ss:$16 sps:$4 sm:$0xff]   ;;  %v1840_v55 = vld [vmem:[#allocation6 + $0x160] ss:$16 sps:$4 sm:$0xff]   ;;  %v1889_v26 = vld [vmem:[#allocation6 + $0x6c] ss:$16 sps:$4 sm:$0xff]  }
  0x41   :  { %v1838_v54 = vld [vmem:[#allocation6 + $0x364] ss:$16 sps:$4 sm:$0xff]   ;;  %v1841_v56 = vld [vmem:[#allocation6 + $0x360] ss:$16 sps:$4 sm:$0xff]  }
  0x42   :  { %1259 = vmatpush1.bf16.msra.mxu0 %v1804_v27  ;;  %v1842_v57 = vld [vmem:[#allocation6 + $0x144] ss:$16 sps:$4 sm:$0xff]   ;;  %v1846_v59 = vld [vmem:[#allocation6 + $0x140] ss:$16 sps:$4 sm:$0xff]  }
  0x43   :  { %1300 = vmatpush1.bf16.msra.mxu1 %v1805_v28  ;;  %1260 = vmatprep.subr.bf16.mxu0 %v1806_v29  ;;  %v1844_v58 = vld [vmem:[#allocation6 + $0x344] ss:$16 sps:$4 sm:$0xff]   ;;  %v1847_v60 = vld [vmem:[#allocation6 + $0x340] ss:$16 sps:$4 sm:$0xff]   ;;  %v1887_v28 = vld [vmem:[#allocation6 + $0x68] ss:$16 sps:$4 sm:$0xff]  }
  0x44   :  { %1301 = vmatprep.subr.bf16.mxu1 %v1808_v30  ;;  %v1848_v61 = vld [vmem:[#allocation6 + $0x124] ss:$16 sps:$4 sm:$0xff]   ;;  %v1852_v63 = vld [vmem:[#allocation6 + $0x120] ss:$16 sps:$4 sm:$0xff]   ;;  %v1895_v30 = vld [vmem:[#allocation6 + $0x4c] ss:$16 sps:$4 sm:$0xff]  }
  0x45   :  { %v1850_v62 = vld [vmem:[#allocation6 + $0x324] ss:$16 sps:$4 sm:$0xff]   ;;  %v1853_v0 = vld [vmem:[#allocation6 + $0x320] ss:$16 sps:$4 sm:$0xff]  }
  0x46   :  { %1261 = vmatpush1.bf16.msra.mxu0 %v1810_v31  ;;  %v1854_v1 = vld [vmem:[#allocation6 + $0x104] ss:$16 sps:$4 sm:$0xff]   ;;  %v1858_v3 = vld [vmem:[#allocation6 + $0x100] ss:$16 sps:$4 sm:$0xff]  }
  0x47   :  { %1302 = vmatpush1.bf16.msra.mxu1 %v1811_v32  ;;  %1262 = vmatprep.subr.bf16.mxu0 %v1812_v33  ;;  %v1856_v2 = vld [vmem:[#allocation6 + $0x304] ss:$16 sps:$4 sm:$0xff]   ;;  %v1859_v4 = vld [vmem:[#allocation6 + $0x300] ss:$16 sps:$4 sm:$0xff]   ;;  %v1893_v32 = vld [vmem:[#allocation6 + $0x48] ss:$16 sps:$4 sm:$0xff]  }
  0x48   :  { %1303 = vmatprep.subr.bf16.mxu1 %v1814_v34  ;;  %v60_v5 = vld [vmem:[#allocation3] sm:$0xff]  ;;  %v62_v6 = vld [vmem:[#allocation3 + $0x10] sm:$0xff]  ;;  %v1901_v34 = vld [vmem:[#allocation6 + $0x2c] ss:$16 sps:$4 sm:$0xff]  }
  0x49   :  { %v1862_v7 = vld [vmem:[#allocation6 + $0x4e4] ss:$16 sps:$4 sm:$0xff]   ;;  %v2193_v9 = vpack.c.bf16 %v60_v5, %v60_v5  ;;  %v2195_v10 = vpack.c.bf16 %v62_v6, %v62_v6  ;;  %v1860_v11 = vld [vmem:[#allocation6 + $0x4e0] ss:$16 sps:$4 sm:$0xff]   ;;  %v1949_v5 = vld [vmem:[#allocation6 + $0x12c] ss:$16 sps:$4 sm:$0xff]  }
  0x4a   :  { %1263 = vmatpush2.bf16.msra.mxu0 %v1816_v35  ;;  %v1868_v13 = vld [vmem:[#allocation6 + $0x4c4] ss:$16 sps:$4 sm:$0xff]   ;;  %v1866_v15 = vld [vmem:[#allocation6 + $0x4c0] ss:$16 sps:$4 sm:$0xff]   ;;  %v65_v35 = vld [vmem:[#allocation3 + $0x28] sm:$0xff] }
  0x4b   :  { %1304 = vmatpush2.bf16.msra.mxu1 %v1817_v36  ;;  %1264 = vmatprep.subr.bf16.mxu0 %v1818_v37  ;;  %v1874_v17 = vld [vmem:[#allocation6 + $0x4a4] ss:$16 sps:$4 sm:$0xff]   ;;  %v1872_v19 = vld [vmem:[#allocation6 + $0x4a0] ss:$16 sps:$4 sm:$0xff]   ;;  %v2200_v36 = vpack.c.bf16 %v65_v35, %v65_v35  ;;  %v1991_v35 = vld [vmem:[#allocation6 + $0x44c] ss:$16 sps:$4 sm:$0xff]  }
  0x4c   :  { %1305 = vmatprep.subr.bf16.mxu1 %v1820_v38  ;;  %v1880_v21 = vld [vmem:[#allocation6 + $0x484] ss:$16 sps:$4 sm:$0xff]   ;;  %v1878_v23 = vld [vmem:[#allocation6 + $0x480] ss:$16 sps:$4 sm:$0xff]   ;;  %v1899_v38 = vld [vmem:[#allocation6 + $0x28] ss:$16 sps:$4 sm:$0xff]  }
  0x4d   :  { %v1886_v25 = vld [vmem:[#allocation6 + $0x464] ss:$16 sps:$4 sm:$0xff]   ;;  %v1884_v27 = vld [vmem:[#allocation6 + $0x460] ss:$16 sps:$4 sm:$0xff]  }
  0x4e   :  { %1265 = vmatpush2.bf16.msra.mxu0 %v1822_v39  ;;  %v1892_v29 = vld [vmem:[#allocation6 + $0x444] ss:$16 sps:$4 sm:$0xff]   ;;  %v1890_v31 = vld [vmem:[#allocation6 + $0x440] ss:$16 sps:$4 sm:$0xff]  }
  0x4f   :  { %1306 = vmatpush2.bf16.msra.mxu1 %v1823_v40  ;;  %1266 = vmatprep.subr.bf16.mxu0 %v1824_v41  ;;  %v1898_v33 = vld [vmem:[#allocation6 + $0x424] ss:$16 sps:$4 sm:$0xff]   ;;  %v1896_v37 = vld [vmem:[#allocation6 + $0x420] ss:$16 sps:$4 sm:$0xff]   ;;  %v1907_v40 = vld [vmem:[#allocation6 + $0xc] ss:$16 sps:$4 sm:$0xff]  }
  0x50   :  { %1307 = vmatprep.subr.bf16.mxu1 %v1826_v42  ;;  %v1904_v39 = vld [vmem:[#allocation6 + $0x404] ss:$16 sps:$4 sm:$0xff]   ;;  %v1902_v41 = vld [vmem:[#allocation6 + $0x400] ss:$16 sps:$4 sm:$0xff]   ;;  %v1905_v42 = vld [vmem:[#allocation6 + $0x8] ss:$16 sps:$4 sm:$0xff]  }
  0x51   :  { %v1916_v47 = vld [vmem:[#allocation6 + $0x5c4] ss:$16 sps:$4 sm:$0xff]   ;;  %v1944_v6 = vld [vmem:[#allocation6 + $0x520] ss:$16 sps:$4 sm:$0xff]  }
  0x52   :  { %1267 = vmatpush2.bf16.msra.mxu0 %v1828_v43  ;;  %v1910_v43 = vld [vmem:[#allocation6 + $0x5e4] ss:$16 sps:$4 sm:$0xff]  }
  0x53   :  { %1308 = vmatpush2.bf16.msra.mxu1 %v1829_v44  ;;  %1268 = vmatprep.subr.bf16.mxu0 %v1830_v45  ;;  %v1913_v44 = vld [vmem:[#allocation6 + $0x1ec] ss:$16 sps:$4 sm:$0xff]   ;;  %v1908_v45 = vld [vmem:[#allocation6 + $0x5e0] ss:$16 sps:$4 sm:$0xff]   ;;  %v1922_v51 = vld [vmem:[#allocation6 + $0x5a4] ss:$16 sps:$4 sm:$0xff]  }
  0x54   :  { %1309 = vmatprep.subr.bf16.mxu1 %v1832_v46  ;;  %v1911_v46 = vld [vmem:[#allocation6 + $0x1e8] ss:$16 sps:$4 sm:$0xff]  }
  0x56   :  { %1269 = vmatpush2.bf16.msra.mxu0 %v1834_v48  ;;  %v1919_v48 = vld [vmem:[#allocation6 + $0x1cc] ss:$16 sps:$4 sm:$0xff]  }
  0x57   :  { %1310 = vmatpush2.bf16.msra.mxu1 %v1835_v49  ;;  %1270 = vmatprep.subr.bf16.mxu0 %v1836_v52  ;;  %v1914_v49 = vld [vmem:[#allocation6 + $0x5c0] ss:$16 sps:$4 sm:$0xff]   ;;  %v1925_v52 = vld [vmem:[#allocation6 + $0x1ac] ss:$16 sps:$4 sm:$0xff]  }
  0x58   :  { %1311 = vmatprep.subr.bf16.mxu1 %v1838_v54  ;;  %v1920_v54 = vld [vmem:[#allocation6 + $0x5a0] ss:$16 sps:$4 sm:$0xff]  }
  0x5a   :  { %1271 = vmatpush2.bf16.msra.mxu0 %v1840_v55  ;;  %v1923_v55 = vld [vmem:[#allocation6 + $0x1a8] ss:$16 sps:$4 sm:$0xff]  }
  0x5b   :  { %1312 = vmatpush2.bf16.msra.mxu1 %v1841_v56  ;;  %1272 = vmatprep.subr.bf16.mxu0 %v1842_v57  ;;  %v1928_v56 = vld [vmem:[#allocation6 + $0x584] ss:$16 sps:$4 sm:$0xff]   ;;  %v1931_v57 = vld [vmem:[#allocation6 + $0x18c] ss:$16 sps:$4 sm:$0xff]  }
  0x5c   :  { %1313 = vmatprep.subr.bf16.mxu1 %v1844_v58  ;;  %v1926_v58 = vld [vmem:[#allocation6 + $0x580] ss:$16 sps:$4 sm:$0xff]  }
  0x5e   :  { %1273 = vmatpush2.bf16.msra.mxu0 %v1846_v59  ;;  %v1929_v59 = vld [vmem:[#allocation6 + $0x188] ss:$16 sps:$4 sm:$0xff]  }
  0x5f   :  { %1314 = vmatpush2.bf16.msra.mxu1 %v1847_v60  ;;  %1274 = vmatprep.subr.bf16.mxu0 %v1848_v61  ;;  %v1934_v60 = vld [vmem:[#allocation6 + $0x564] ss:$16 sps:$4 sm:$0xff]   ;;  %v1937_v61 = vld [vmem:[#allocation6 + $0x16c] ss:$16 sps:$4 sm:$0xff]  }
  0x60   :  { %1315 = vmatprep.subr.bf16.mxu1 %v1850_v62  ;;  %v1932_v62 = vld [vmem:[#allocation6 + $0x560] ss:$16 sps:$4 sm:$0xff]  }
  0x62   :  { %1275 = vmatpush2.bf16.msra.mxu0 %v1852_v63  ;;  %v1935_v63 = vld [vmem:[#allocation6 + $0x168] ss:$16 sps:$4 sm:$0xff]  }
  0x63   :  { %1316 = vmatpush2.bf16.msra.mxu1 %v1853_v0  ;;  %1276 = vmatprep.subr.bf16.mxu0 %v1854_v1  ;;  %v1940_v0 = vld [vmem:[#allocation6 + $0x544] ss:$16 sps:$4 sm:$0xff]   ;;  %v1943_v1 = vld [vmem:[#allocation6 + $0x14c] ss:$16 sps:$4 sm:$0xff]  }
  0x64   :  { %1317 = vmatprep.subr.bf16.mxu1 %v1856_v2  ;;  %v1938_v2 = vld [vmem:[#allocation6 + $0x540] ss:$16 sps:$4 sm:$0xff]  }
  0x66   :  { %1277 = vmatpush2.bf16.msra.mxu0 %v1858_v3  ;;  %v1941_v3 = vld [vmem:[#allocation6 + $0x148] ss:$16 sps:$4 sm:$0xff]  }
  0x67   :  { %1318 = vmatpush2.bf16.msra.mxu1 %v1859_v4  ;;  %1328 = vmatprep.subr.bf16.mxu0 %v1862_v7  ;;  %v1946_v4 = vld [vmem:[#allocation6 + $0x524] ss:$16 sps:$4 sm:$0xff]   ;;  %v1947_v7 = vld [vmem:[#allocation6 + $0x128] ss:$16 sps:$4 sm:$0xff]  }
  0x68   :  { %1369 = vmatprep.subr.bf16.mxu1 %v1865_v8  ;;  %v1952_v8 = vld [vmem:[#allocation6 + $0x504] ss:$16 sps:$4 sm:$0xff]  }
  0x69   :  { %1279 = vmatmul.mubr.bf16.vlgmr.msra.gmra.mxu0 %v2193_v9 }
  0x6a   :  { %1320 = vmatmul.mubr.bf16.vlgmr.msra.gmra.mxu1 %v2195_v10  ;;  %1329 = vmatpush1.bf16.msra.mxu0 %v1860_v11  ;;  %v1955_v11 = vld [vmem:[#allocation6 + $0x10c] ss:$16 sps:$4 sm:$0xff]  }
  0x6b   :  { %1370 = vmatpush1.bf16.msra.mxu1 %v1863_v12  ;;  %1330 = vmatprep.subr.bf16.mxu0 %v1868_v13  ;;  %v1950_v12 = vld [vmem:[#allocation6 + $0x500] ss:$16 sps:$4 sm:$0xff]   ;;  %v1953_v13 = vld [vmem:[#allocation6 + $0x108] ss:$16 sps:$4 sm:$0xff]  }
  0x6c   :  { %1371 = vmatprep.subr.bf16.mxu1 %v1871_v14  ;;  %1401 = vmatprep.mubr.bf16.mxu1 %v2187_v50  ;;  %v1917_v50 = vld [vmem:[#allocation6 + $0x1c8] ss:$16 sps:$4 sm:$0xff]   ;;  %v64_v14 = vld [vmem:[#allocation3 + $0x20] sm:$0xff] }
  0x6d   :  { %1360 = vmatprep.mubr.bf16.mxu0 %v2200_v36 }
  0x6e   :  { %1331 = vmatpush1.bf16.msra.mxu0 %v1866_v15  ;;  %v1958_v15 = vld [vmem:[#allocation6 + $0x2ec] ss:$16 sps:$4 sm:$0xff]  }
  0x6f   :  { %1372 = vmatpush1.bf16.msra.mxu1 %v1869_v16  ;;  %1332 = vmatprep.subr.bf16.mxu0 %v1874_v17  ;;  %v1961_v16 = vld [vmem:[#allocation6 + $0x4ec] ss:$16 sps:$4 sm:$0xff]   ;;  %v2203_v17 = vpack.c.bf16 %v64_v14, %v64_v14 }
  0x70   :  { %1373 = vmatprep.subr.bf16.mxu1 %v1877_v18  ;;  %v1956_v18 = vld [vmem:[#allocation6 + $0x2e8] ss:$16 sps:$4 sm:$0xff]   ;;  %v2051_v14 = vld [vmem:[#allocation6 + $0x50c] ss:$16 sps:$4 sm:$0xff]  }
  0x72   :  { %1333 = vmatpush1.bf16.msra.mxu0 %v1872_v19  ;;  %v1959_v19 = vld [vmem:[#allocation6 + $0x4e8] ss:$16 sps:$4 sm:$0xff]  }
  0x73   :  { %1374 = vmatpush1.bf16.msra.mxu1 %v1875_v20  ;;  %1334 = vmatprep.subr.bf16.mxu0 %v1880_v21  ;;  %v1964_v20 = vld [vmem:[#allocation6 + $0x2cc] ss:$16 sps:$4 sm:$0xff]  }
  0x74   :  { %1375 = vmatprep.subr.bf16.mxu1 %v1883_v22  ;;  %v1967_v21 = vld [vmem:[#allocation6 + $0x4cc] ss:$16 sps:$4 sm:$0xff]   ;;  %v1962_v22 = vld [vmem:[#allocation6 + $0x2c8] ss:$16 sps:$4 sm:$0xff]  }
  0x76   :  { %1335 = vmatpush1.bf16.msra.mxu0 %v1878_v23  ;;  %v1965_v23 = vld [vmem:[#allocation6 + $0x4c8] ss:$16 sps:$4 sm:$0xff]  }
  0x77   :  { %1376 = vmatpush1.bf16.msra.mxu1 %v1881_v24  ;;  %1336 = vmatprep.subr.bf16.mxu0 %v1886_v25  ;;  %v1970_v24 = vld [vmem:[#allocation6 + $0x2ac] ss:$16 sps:$4 sm:$0xff]  }
  0x78   :  { %1377 = vmatprep.subr.bf16.mxu1 %v1889_v26  ;;  %v1973_v25 = vld [vmem:[#allocation6 + $0x4ac] ss:$16 sps:$4 sm:$0xff]   ;;  %v1968_v26 = vld [vmem:[#allocation6 + $0x2a8] ss:$16 sps:$4 sm:$0xff]  }
  0x7a   :  { %1337 = vmatpush1.bf16.msra.mxu0 %v1884_v27  ;;  %v1971_v27 = vld [vmem:[#allocation6 + $0x4a8] ss:$16 sps:$4 sm:$0xff]  }
  0x7b   :  { %1378 = vmatpush1.bf16.msra.mxu1 %v1887_v28  ;;  %1338 = vmatprep.subr.bf16.mxu0 %v1892_v29  ;;  %v1976_v28 = vld [vmem:[#allocation6 + $0x28c] ss:$16 sps:$4 sm:$0xff]   ;;  %v1974_v29 = vld [vmem:[#allocation6 + $0x288] ss:$16 sps:$4 sm:$0xff]  }
  0x7c   :  { %1379 = vmatprep.subr.bf16.mxu1 %v1895_v30  ;;  %v1977_v30 = vld [vmem:[#allocation6 + $0x488] ss:$16 sps:$4 sm:$0xff]  }
  0x7e   :  { %1339 = vmatpush1.bf16.msra.mxu0 %v1890_v31  ;;  %v1982_v31 = vld [vmem:[#allocation6 + $0x26c] ss:$16 sps:$4 sm:$0xff]  }
  0x7f   :  { %1380 = vmatpush1.bf16.msra.mxu1 %v1893_v32  ;;  %1340 = vmatprep.subr.bf16.mxu0 %v1898_v33  ;;  %v1985_v32 = vld [vmem:[#allocation6 + $0x46c] ss:$16 sps:$4 sm:$0xff]   ;;  %v1983_v33 = vld [vmem:[#allocation6 + $0x468] ss:$16 sps:$4 sm:$0xff]  }
  0x80   :  { %1381 = vmatprep.subr.bf16.mxu1 %v1901_v34  ;;  %v1988_v34 = vld [vmem:[#allocation6 + $0x24c] ss:$16 sps:$4 sm:$0xff]  }
  0x82   :  { %1341 = vmatpush1.bf16.msra.mxu0 %v1896_v37  ;;  %v1989_v37 = vld [vmem:[#allocation6 + $0x448] ss:$16 sps:$4 sm:$0xff]  }
  0x83   :  { %1382 = vmatpush1.bf16.msra.mxu1 %v1899_v38  ;;  %1342 = vmatprep.subr.bf16.mxu0 %v1904_v39  ;;  %v1994_v38 = vld [vmem:[#allocation6 + $0x22c] ss:$16 sps:$4 sm:$0xff]  }
  0x84   :  { %1383 = vmatprep.subr.bf16.mxu1 %v1907_v40  ;;  %v1997_v39 = vld [vmem:[#allocation6 + $0x42c] ss:$16 sps:$4 sm:$0xff]   ;;  %v1992_v40 = vld [vmem:[#allocation6 + $0x228] ss:$16 sps:$4 sm:$0xff]  }
  0x86   :  { %1343 = vmatpush1.bf16.msra.mxu0 %v1902_v41  ;;  %v1995_v41 = vld [vmem:[#allocation6 + $0x428] ss:$16 sps:$4 sm:$0xff]  }
  0x87   :  { %1384 = vmatpush1.bf16.msra.mxu1 %v1905_v42  ;;  %1344 = vmatprep.subr.bf16.mxu0 %v1910_v43  ;;  %v2000_v42 = vld [vmem:[#allocation6 + $0x20c] ss:$16 sps:$4 sm:$0xff]  }
  0x88   :  { %1385 = vmatprep.subr.bf16.mxu1 %v1913_v44  ;;  %v2003_v43 = vld [vmem:[#allocation6 + $0x40c] ss:$16 sps:$4 sm:$0xff]   ;;  %v1998_v44 = vld [vmem:[#allocation6 + $0x208] ss:$16 sps:$4 sm:$0xff]  }
  0x8a   :  { %1345 = vmatpush2.bf16.msra.mxu0 %v1908_v45  ;;  %v2001_v45 = vld [vmem:[#allocation6 + $0x408] ss:$16 sps:$4 sm:$0xff]  }
  0x8b   :  { %1386 = vmatpush2.bf16.msra.mxu1 %v1911_v46  ;;  %1346 = vmatprep.subr.bf16.mxu0 %v1916_v47  ;;  %v2006_v46 = vld [vmem:[#allocation6 + $0x3ec] ss:$16 sps:$4 sm:$0xff]  }
  0x8c   :  { %1387 = vmatprep.subr.bf16.mxu1 %v1919_v48  ;;  %v2009_v47 = vld [vmem:[#allocation6 + $0x5ec] ss:$16 sps:$4 sm:$0xff]   ;;  %v2004_v48 = vld [vmem:[#allocation6 + $0x3e8] ss:$16 sps:$4 sm:$0xff]  }
  0x8e   :  { %1347 = vmatpush2.bf16.msra.mxu0 %v1914_v49  ;;  %v2007_v49 = vld [vmem:[#allocation6 + $0x5e8] ss:$16 sps:$4 sm:$0xff]  }
  0x8f   :  { %1388 = vmatpush2.bf16.msra.mxu1 %v1917_v50  ;;  %1348 = vmatprep.subr.bf16.mxu0 %v1922_v51  ;;  %v2012_v50 = vld [vmem:[#allocation6 + $0x3cc] ss:$16 sps:$4 sm:$0xff]  }
  0x90   :  { %1389 = vmatprep.subr.bf16.mxu1 %v1925_v52  ;;  %v2015_v51 = vld [vmem:[#allocation6 + $0x5cc] ss:$16 sps:$4 sm:$0xff]   ;;  %v2010_v52 = vld [vmem:[#allocation6 + $0x3c8] ss:$16 sps:$4 sm:$0xff]  }
  0x92   :  { %1349 = vmatpush2.bf16.msra.mxu0 %v1920_v54  ;;  %v2013_v54 = vld [vmem:[#allocation6 + $0x5c8] ss:$16 sps:$4 sm:$0xff]  }
  0x93   :  { %1390 = vmatpush2.bf16.msra.mxu1 %v1923_v55  ;;  %1350 = vmatprep.subr.bf16.mxu0 %v1928_v56  ;;  %v2018_v55 = vld [vmem:[#allocation6 + $0x3ac] ss:$16 sps:$4 sm:$0xff]  }
  0x94   :  { %1391 = vmatprep.subr.bf16.mxu1 %v1931_v57  ;;  %v2021_v56 = vld [vmem:[#allocation6 + $0x5ac] ss:$16 sps:$4 sm:$0xff]   ;;  %v2016_v57 = vld [vmem:[#allocation6 + $0x3a8] ss:$16 sps:$4 sm:$0xff]  }
  0x96   :  { %1351 = vmatpush2.bf16.msra.mxu0 %v1926_v58  ;;  %v2019_v58 = vld [vmem:[#allocation6 + $0x5a8] ss:$16 sps:$4 sm:$0xff]  }
  0x97   :  { %1392 = vmatpush2.bf16.msra.mxu1 %v1929_v59  ;;  %1352 = vmatprep.subr.bf16.mxu0 %v1934_v60  ;;  %v2024_v59 = vld [vmem:[#allocation6 + $0x38c] ss:$16 sps:$4 sm:$0xff]  }
  0x98   :  { %1393 = vmatprep.subr.bf16.mxu1 %v1937_v61  ;;  %v2027_v60 = vld [vmem:[#allocation6 + $0x58c] ss:$16 sps:$4 sm:$0xff]   ;;  %v2022_v61 = vld [vmem:[#allocation6 + $0x388] ss:$16 sps:$4 sm:$0xff]  }
  0x9a   :  { %1353 = vmatpush2.bf16.msra.mxu0 %v1932_v62  ;;  %v2025_v62 = vld [vmem:[#allocation6 + $0x588] ss:$16 sps:$4 sm:$0xff]  }
  0x9b   :  { %1394 = vmatpush2.bf16.msra.mxu1 %v1935_v63  ;;  %1354 = vmatprep.subr.bf16.mxu0 %v1940_v0  ;;  %v2030_v63 = vld [vmem:[#allocation6 + $0x36c] ss:$16 sps:$4 sm:$0xff]  }
  0x9c   :  { %1395 = vmatprep.subr.bf16.mxu1 %v1943_v1  ;;  %v2033_v0 = vld [vmem:[#allocation6 + $0x56c] ss:$16 sps:$4 sm:$0xff]   ;;  %v2028_v1 = vld [vmem:[#allocation6 + $0x368] ss:$16 sps:$4 sm:$0xff]  }
  0x9e   :  { %1355 = vmatpush2.bf16.msra.mxu0 %v1938_v2  ;;  %v2031_v2 = vld [vmem:[#allocation6 + $0x568] ss:$16 sps:$4 sm:$0xff]  }
  0x9f   :  { %1396 = vmatpush2.bf16.msra.mxu1 %v1941_v3  ;;  %1356 = vmatprep.subr.bf16.mxu0 %v1946_v4  ;;  %v2036_v3 = vld [vmem:[#allocation6 + $0x34c] ss:$16 sps:$4 sm:$0xff]  }
  0xa0   :  { %1397 = vmatprep.subr.bf16.mxu1 %v1949_v5  ;;  %v2039_v4 = vld [vmem:[#allocation6 + $0x54c] ss:$16 sps:$4 sm:$0xff]   ;;  %v2034_v5 = vld [vmem:[#allocation6 + $0x348] ss:$16 sps:$4 sm:$0xff]  }
  0xa2   :  { %1357 = vmatpush2.bf16.msra.mxu0 %v1944_v6  ;;  %v2037_v6 = vld [vmem:[#allocation6 + $0x548] ss:$16 sps:$4 sm:$0xff]  }
  0xa3   :  { %1398 = vmatpush2.bf16.msra.mxu1 %v1947_v7  ;;  %1358 = vmatprep.subr.bf16.mxu0 %v1952_v8  ;;  %v2042_v7 = vld [vmem:[#allocation6 + $0x32c] ss:$16 sps:$4 sm:$0xff]  }
  0xa4   :  { %1399 = vmatprep.subr.bf16.mxu1 %v1955_v11  ;;  %v2045_v8 = vld [vmem:[#allocation6 + $0x52c] ss:$16 sps:$4 sm:$0xff]   ;;  %v2040_v11 = vld [vmem:[#allocation6 + $0x328] ss:$16 sps:$4 sm:$0xff]  }
  0xa6   :  { %1359 = vmatpush2.bf16.msra.mxu0 %v1950_v12  ;;  %v2043_v12 = vld [vmem:[#allocation6 + $0x528] ss:$16 sps:$4 sm:$0xff]  }
  0xa7   :  { %1400 = vmatpush2.bf16.msra.mxu1 %v1953_v13  ;;  %1410 = vmatprep.subr.bf16.mxu0 %v1958_v15  ;;  %v2048_v13 = vld [vmem:[#allocation6 + $0x30c] ss:$16 sps:$4 sm:$0xff]   ;;  %v2046_v15 = vld [vmem:[#allocation6 + $0x308] ss:$16 sps:$4 sm:$0xff]  }
  0xa8   :  { %1451 = vmatprep.subr.bf16.mxu1 %v1961_v16  ;;  %v2049_v16 = vld [vmem:[#allocation6 + $0x508] ss:$16 sps:$4 sm:$0xff]  }
  0xa9   :  { %1361 = vmatmul.mubr.bf16.vlgmr.msra.gmra.mxu0 %v2203_v17 }
  0xaa   :  { %1402 = vmatmul.mubr.bf16.vlgmr.msra.gmra.mxu1 %v2193_v9  ;;  %1411 = vmatpush1.bf16.msra.mxu0 %v1956_v18  ;;  %v1979_v9 = vld [vmem:[#allocation6 + $0x48c] ss:$16 sps:$4 sm:$0xff]   ;;  %v266_v18 = vlaneseq }
  0xab   :  { %1452 = vmatpush1.bf16.msra.mxu1 %v1959_v19  ;;  %1412 = vmatprep.subr.bf16.mxu0 %v1964_v20 }
  0xac   :  { %1453 = vmatprep.subr.bf16.mxu1 %v1967_v21  ;;  %1442 = vmatprep.mubr.bf16.mxu0 %v2189_v53  ;;  %v1980_v53 = vld [vmem:[#allocation6 + $0x268] ss:$16 sps:$4 sm:$0xff]   ;;  %v2212_v19 = vshrl.u32 %v266_v18, 7  ;;  %v264_v21 = vld [vmem:[%s2233_s2] sm:$0xf]  ;;  %s2144_s2 = smov [#allocation9]  }
  0xad   :  { %1483 = vmatprep.mubr.bf16.mxu1 %v2200_v36  ;;  %v1986_v36 = vld [vmem:[#allocation6 + $0x248] ss:$16 sps:$4 sm:$0xff]   ;;  %s1554_s10 = sshll.u32 %s2144_s2, 4  ;;  %s1555_s10 = int_to_ptr.vmem [resolvable:$true] %s1554_s10 }
  0xae   :  { %1413 = vmatpush1.bf16.msra.mxu0 %v1962_v22  ;;  %v2215_v20 = vsub.s32 0, %v2212_v19  ;;  %v272_v22 = vsub.s32 1, %v2212_v19  ;;  %s2112_s11 = scalar_lea.vmem %s1555_s10, 16  ;;  %s2116_s12 = scalar_lea.vmem %s1555_s10, 32 }
  0xaf   :  { %1454 = vmatpush1.bf16.msra.mxu1 %v1965_v23  ;;  %1414 = vmatprep.subr.bf16.mxu0 %v1970_v24  ;;  %p2113_p1 = scmp.ne.s32.totalorder %s1555_s10, %s2112_s11  ;;  %p2117_p2 = scmp.lt.s32.totalorder %s1555_s10, %s1555_s10 }
  0xb0   :  { %1455 = vmatprep.subr.bf16.mxu1 %v1973_v25  ;;  %v269_v23 = vrot.slane %v264_v21, %v2215_v20  ;;  %v273_v24 = vrot.slane %v264_v21, %v272_v22  ;;  %p2118_p3 = scmp.lt.s32.totalorder %s2116_s12, %s2112_s11 }
  0xb2   :  { %1415 = vmatpush1.bf16.msra.mxu0 %v1968_v26  ;;  %p2119_p4 = por %p2118_p3, %p2117_p2 }
  0xb3   :  { %1456 = vmatpush1.bf16.msra.mxu1 %v1971_v27  ;;  %1416 = vmatprep.subr.bf16.mxu0 %v1976_v28 }
  0xb4   :  { %1457 = vmatprep.subr.bf16.mxu1 %v1979_v9  ;;  %p2120_p5 = pnand %p2119_p4, %p2113_p1 }
  0xb6   :  { %1417 = vmatpush1.bf16.msra.mxu0 %v1974_v29 }
  0xb7   :  { %1458 = vmatpush1.bf16.msra.mxu1 %v1977_v30  ;;  %1418 = vmatprep.subr.bf16.mxu0 %v1982_v31 }
  0xb8   :  { %1459 = vmatprep.subr.bf16.mxu1 %v1985_v32 }
  0xba   :  { %1419 = vmatpush1.bf16.msra.mxu0 %v1980_v53 }
  0xbb   :  { %1460 = vmatpush1.bf16.msra.mxu1 %v1983_v33  ;;  %1420 = vmatprep.subr.bf16.mxu0 %v1988_v34  ;;  %v2143_v33 = vmov 0  }
  0xbc   :  { %1461 = vmatprep.subr.bf16.mxu1 %v1991_v35  ;;  %1763 = vset.pattern.permute.xlu0 %v2143_v33  ;;  %v1496_v35 = vld [vmem:[#allocation8] sm:$0xf] }
  0xbe   :  { %1421 = vmatpush1.bf16.msra.mxu0 %v1986_v36 }
  0xbf   :  { %1462 = vmatpush1.bf16.msra.mxu1 %v1989_v37  ;;  %1422 = vmatprep.subr.bf16.mxu0 %v1994_v38 }
  0xc0   :  { %1463 = vmatprep.subr.bf16.mxu1 %v1997_v39 }
  0xc2   :  { %1423 = vmatpush1.bf16.msra.mxu0 %v1992_v40 }
  0xc3   :  { %1464 = vmatpush1.bf16.msra.mxu1 %v1995_v41  ;;  %1424 = vmatprep.subr.bf16.mxu0 %v2000_v42  ;;  %v1501_v41 = vrot.slane %v1496_v35, %v2215_v20 }
  0xc4   :  { %1465 = vmatprep.subr.bf16.mxu1 %v2003_v43  ;;  %v1505_v43 = vrot.slane %v1496_v35, %v272_v22 }
  0xc6   :  { %1425 = vmatpush1.bf16.msra.mxu0 %v1998_v44 }
  0xc7   :  { %1466 = vmatpush1.bf16.msra.mxu1 %v2001_v45  ;;  %1426 = vmatprep.subr.bf16.mxu0 %v2006_v46 }
  0xc8   :  { %1467 = vmatprep.subr.bf16.mxu1 %v2009_v47 }
  0xca   :  { %1427 = vmatpush2.bf16.msra.mxu0 %v2004_v48 }
  0xcb   :  { %1468 = vmatpush2.bf16.msra.mxu1 %v2007_v49  ;;  %1428 = vmatprep.subr.bf16.mxu0 %v2012_v50 }
  0xcc   :  { %1469 = vmatprep.subr.bf16.mxu1 %v2015_v51 }
  0xce   :  { %1429 = vmatpush2.bf16.msra.mxu0 %v2010_v52  ;;  %v276_v52 = vsub.s32 2, %v2212_v19 }
  0xcf   :  { %1470 = vmatpush2.bf16.msra.mxu1 %v2013_v54  ;;  %1430 = vmatprep.subr.bf16.mxu0 %v2018_v55  ;;  %v280_v54 = vsub.s32 3, %v2212_v19 }
  0xd0   :  { %1471 = vmatprep.subr.bf16.mxu1 %v2021_v56  ;;  %v277_v55 = vrot.slane %v264_v21, %v276_v52 }
  0xd1   :  { %v281_v56 = vrot.slane %v264_v21, %v280_v54  ;;  %v1527_v21 = vld [vmem:[#allocation2] sm:$0x1] }
  0xd2   :  { %1431 = vmatpush2.bf16.msra.mxu0 %v2016_v57 }
  0xd3   :  { %1472 = vmatpush2.bf16.msra.mxu1 %v2019_v58  ;;  %1432 = vmatprep.subr.bf16.mxu0 %v2024_v59 }
  0xd4   :  { %1473 = vmatprep.subr.bf16.mxu1 %v2027_v60 }
  0xd6   :  { %1433 = vmatpush2.bf16.msra.mxu0 %v2022_v61 }
  0xd7   :  { %1474 = vmatpush2.bf16.msra.mxu1 %v2025_v62  ;;  %1434 = vmatprep.subr.bf16.mxu0 %v2030_v63 }
  0xd8   :  { %1475 = vmatprep.subr.bf16.mxu1 %v2033_v0 }
  0xda   :  { %1435 = vmatpush2.bf16.msra.mxu0 %v2028_v1  ;;  %v1509_v1 = vrot.slane %v1496_v35, %v276_v52 }
  0xdb   :  { %1476 = vmatpush2.bf16.msra.mxu1 %v2031_v2  ;;  %1436 = vmatprep.subr.bf16.mxu0 %v2036_v3 }
  0xdc   :  { %1477 = vmatprep.subr.bf16.mxu1 %v2039_v4 }
  0xde   :  { %1437 = vmatpush2.bf16.msra.mxu0 %v2034_v5 }
  0xdf   :  { %1478 = vmatpush2.bf16.msra.mxu1 %v2037_v6  ;;  %1438 = vmatprep.subr.bf16.mxu0 %v2042_v7  ;;  %v1513_v7 = vrot.slane %v1496_v35, %v280_v54 }
  0xe0   :  { %1479 = vmatprep.subr.bf16.mxu1 %v2045_v8 }
  0xe2   :  { %1439 = vmatpush2.bf16.msra.mxu0 %v2040_v11 }
  0xe3   :  { %1480 = vmatpush2.bf16.msra.mxu1 %v2043_v12  ;;  %1440 = vmatprep.subr.bf16.mxu0 %v2048_v13 }
  0xe4   :  { %1481 = vmatprep.subr.bf16.mxu1 %v2051_v14 }
  0xe6   :  { %1441 = vmatpush2.bf16.msra.mxu0 %v2046_v15 }
  0xe7   :  { %1482 = vmatpush2.bf16.msra.mxu1 %v2049_v16 }
  0xe9   :  { %1443 = vmatmul.mubr.bf16.vlgmr.msra.gmra.mxu0 %v2195_v10 }
  0xea   :  { %1484 = vmatmul.mubr.bf16.vlgmr.msra.gmra.mxu1 %v2203_v17 }
 0x129   :  { %v1280_v25 = vpop.f32.mrf.mxu0 }
 0x12a   :  { %v1321_v10 = vpop.f32.mrf.mxu1  ;;  %v1281_v26 = vadd.f32 %v1280_v25, %v269_v23  ;;  %v1540_v23 = vand.u32 127, %v266_v18 }
 0x12b   :  { %v1282_v17 = vpop.f32.mrf.mxu0 }
 0x12c   :  { %v1323_v27 = vpop.f32.mrf.mxu1  ;;  %v1322_v28 = vadd.f32 %v1321_v10, %v1281_v26  ;;  %v1283_v9 = vadd.f32 %v1282_v17, %v273_v24  ;;  %v1543_v25 = vsub.s32 %v1540_v23, %v2212_v19 }
 0x12d   :  { %v1284_v29 = vpop.f32.mrf.mxu0 }
 0x12e   :  { %v1325_v30 = vpop.f32.mrf.mxu1  ;;  %v1324_v31 = vadd.f32 %v1323_v27, %v1283_v9 }
 0x12f   :  { %v1285_v32 = vpop.f32.mrf.mxu0 }
 0x130   :  { %v1326_v53 = vpop.f32.mrf.mxu1 }
 0x169   :  { %v1362_v34 = vpop.f32.mrf.mxu0 }
 0x16a   :  { %v1403_v36 = vpop.f32.mrf.mxu1  ;;  %v1363_v37 = vadd.f32 %v1362_v34, %v1322_v28 }
 0x16b   :  { %v1364_v38 = vpop.f32.mrf.mxu0  ;;  %v1404_v57 = vadd.f32 %v1403_v36, %v277_v55 }
 0x16c   :  { %v1405_v39 = vpop.f32.mrf.mxu1  ;;  %v1492_v40 = vmax.f32 %v1363_v37, 0.0  ;;  %v1365_v42 = vadd.f32 %v1364_v38, %v1324_v31 }
 0x16d   :  { %v1366_v44 = vpop.f32.mrf.mxu0  ;;  %v1406_v60 = vadd.f32 %v1405_v39, %v281_v56 }
 0x16e   :  { %v1407_v45 = vpop.f32.mrf.mxu1  ;;  %v1493_v46 = vmax.f32 %v1365_v42, 0.0  ;;  %v1518_v49 = vmul.f32 %v1501_v41, %v1492_v40 }
 0x16f   :  { %v1367_v47 = vpop.f32.mrf.mxu0 }
 0x170   :  { %v1408_v48 = vpop.f32.mrf.mxu1  ;;  %v1519_v50 = vmul.f32 %v1505_v43, %v1493_v46 }
 0x172   :  { %v1522_v51 = vadd.f32 %v1519_v50, %v1518_v49 }
 0x1a9   :  { %v1444_v58 = vpop.f32.mrf.mxu0 }
 0x1aa   :  { %v1485_v59 = vpop.f32.mrf.mxu1  ;;  %v1445_v61 = vadd.f32 %v1444_v58, %v1404_v57 }
 0x1ab   :  { %v1446_v62 = vpop.f32.mrf.mxu0 }
 0x1ac   :  { %v1487_v63 = vpop.f32.mrf.mxu1  ;;  %v1486_v0 = vadd.f32 %v1485_v59, %v1445_v61  ;;  %v1447_v2 = vadd.f32 %v1446_v62, %v1406_v60 }
 0x1ad   :  { %v1448_v3 = vpop.f32.mrf.mxu0 }
 0x1ae   :  { %v1489_v4 = vpop.f32.mrf.mxu1  ;;  %v1494_v5 = vmax.f32 %v1486_v0, 0.0  ;;  %v1488_v6 = vadd.f32 %v1487_v63, %v1447_v2 }
 0x1af   :  { %v1449_v8 = vpop.f32.mrf.mxu0 }
 0x1b0   :  { %v1490_v11 = vpop.f32.mrf.mxu1  ;;  %v1520_v12 = vmul.f32 %v1509_v1, %v1494_v5  ;;  %v1495_v13 = vmax.f32 %v1488_v6, 0.0 }
 0x1b2   :  { %v1521_v14 = vmul.f32 %v1513_v7, %v1495_v13  ;;  %v1523_v15 = vadd.f32 %v1522_v51, %v1520_v12 }
 0x1b4   :  { %v1524_v16 = vadd.f32 %v1523_v15, %v1521_v14 }
 0x1b6   :  { %1525 = vadd.xlane.f32.xlu0 %v1524_v16 }
 0x1cc   :  { %1530 = vperm.xlu0 %1763, %v1527_v21  }
 0x23f   :  { %v1526_v22 = vpop.xlane.xlu0 %1525 }
 0x247   :  { %v1531_v24 = vpop.permute.xlu0 %1530 }
 0x248   :  { %v1536_v10 = vrot.slane %v1531_v24, %v2215_v20 }
 0x24a   :  { %v1537_v26 = vadd.f32 %v1536_v10, %v1526_v22 }
 0x24c   :  { %v1544_v17 = vrot.slane %v1537_v26, %v1543_v25 }
 0x24e   :  { %1547 = vst.msk [vmem:[#allocation9] sm:$0x1] %vm1546_vm0, %v1544_v17 }
 0x24f   :  { %2123 = shalt.err (!%p2120_p5)
}
 0x250   :  { %1557 = dma.vmem_to_hbm [thread:$0]  %s1555_s10, 16, %s2236_s5, [#allocation5]  }
 0x251   :  { %2136 = dma.done.wait [#allocation5], 16  }
 0x252   :  { %2137 = vsyncadd [#allocation5], 4294967280 }
 0x253   :  { %1561 = vsyncpa [#allocation4], 1 }
 0x254   :  { %1562 = vsyncpa [#allocation7], 1 }
 0x255   :  { %1563 = vsyncpa [#allocation5], 1 }

</bundles_post_ra>
